<compile_context>
chip_gen: v5e
topology: v5e:2x2
jax: 0.10.0
libtpu: 0.0.40
codegen_flags: <defaults>
</compile_context>

<pallas_src>
import functools

import jax
import jax.numpy as jnp
from jax import lax
from jax.experimental import pallas as pl
from jax.experimental.pallas import tpu as pltpu


# Contract last dim of lhs with last dim of rhs: (M, K) x (N, K) -> (M, N).
_NT_DIMS = (((1,), (1,)), ((), ()))
# Per-instance NT contraction with a leading batch dim:
# (G, N, K) x (G, M, K) -> (G, N, M).
_BATCHED_NT_DIMS = (((2,), (2,)), ((0,), (0,)))


def prediction_layer2_kernel(x_ref, w_ref, b_ref, o_ref, *, group, n_rows,
                             mxu_dtype):
    """One grid step: `group` independent instances, stacked along rows.

    x_ref: (group * n_rows, dim)     f32
    w_ref: (dim, dim)                f32  (out_features, in_features)
    b_ref: (1, dim)                  f32
    o_ref: (n_rows, group * n_rows)  f32  -- column block g = instance g's out
    """
    dim = x_ref.shape[-1]

    x = x_ref[...]                                     # (G*N, D) f32
    w = w_ref[...]                                     # (D, D)   f32
    b = b_ref[...]                                     # (1, D)   f32

    # First matmul: all G instances stacked along M so the MXU sees G*N rows
    # per pass instead of N.  NT contraction, f32 accumulation.
    h = lax.dot_general(x.astype(mxu_dtype), w.astype(mxu_dtype),
                        dimension_numbers=_NT_DIMS,
                        preferred_element_type=jnp.float32)
    h = jnp.maximum(h + b, 0.0)                        # bias + relu in f32 (VPU)

    # Second matmul: per-instance (block-diagonal) NT contraction so no
    # cross-instance products are computed.
    x3 = x.reshape(group, n_rows, dim).astype(mxu_dtype)
    h3 = h.reshape(group, n_rows, dim).astype(mxu_dtype)
    out = lax.dot_general(x3, h3, dimension_numbers=_BATCHED_NT_DIMS,
                          preferred_element_type=jnp.float32)  # (G, N, N) f32

    # Lane-dense store: instance g occupies columns [g*N, (g+1)*N) of the
    # (N, G*N) output block, so the block's HBM writeback DMA is fully dense.
    for g in range(group):
        o_ref[:, g * n_rows:(g + 1) * n_rows] = out[g]


def prediction_layer2_batched(x, w, b, *, group=16, use_bf16=True):
    """B independent PredictionLayer2 forwards in one pallas_call.

    x: (B, N, dim) f32, w: (dim, dim) f32 (out_feat, in_feat), b: (dim,) f32
    -> (B, N, N) f32
    """
    B, N, dim = x.shape
    if B % group != 0:
        raise ValueError(f"batch {B} must be a multiple of group {group}")
    num_steps = B // group
    mxu_dtype = jnp.bfloat16 if use_bf16 else jnp.float32

    x_flat = x.reshape(B * N, dim)     # stack instances along M (rows)
    b2 = b.reshape(1, dim)             # 2D bias for TPU-friendly broadcasting

    flops = B * (2 * N * dim * dim + 2 * N * N * dim)
    bytes_accessed = 4 * (x_flat.size + w.size + b2.size + B * N * N)

    kernel = functools.partial(prediction_layer2_kernel,
                               group=group, n_rows=N, mxu_dtype=mxu_dtype)

    out_slab = pl.pallas_call(
        kernel,
        out_shape=jax.ShapeDtypeStruct((N, B * N), jnp.float32),
        grid=(num_steps,),
        in_specs=[
            # G instances of x per step.
            pl.BlockSpec((group * N, dim), lambda i: (i, 0)),
            # W and b: constant block index -> VMEM-resident, never re-DMA'd.
            pl.BlockSpec((dim, dim), lambda i: (0, 0)),
            pl.BlockSpec((1, dim), lambda i: (0, 0)),
        ],
        # Lane-dense (N, G*N) output block per step (last dim 128 for G=16).
        out_specs=pl.BlockSpec((N, group * N), lambda i: (0, i)),
        compiler_params=pltpu.CompilerParams(
            dimension_semantics=("parallel",)),
        cost_estimate=pl.CostEstimate(
            flops=flops, transcendentals=0, bytes_accessed=bytes_accessed),
    )(x_flat, w, b2)

    # (N, B*N) slab -> (B, N, N): column block j holds instance j's output.
    return out_slab.reshape(N, B, N).transpose(1, 0, 2)


def prediction_layer2(x, w, b, *, use_bf16=False):
    """Single-instance forward, exactly matching the PyTorch module.

    x: (N, dim) f32 -> (N, N) f32
    """
    return prediction_layer2_batched(x[None], w, b, group=1,
                                     use_bf16=use_bf16)[0]


def reference_batched(x, w, b, mxu_dtype=jnp.float32):
    """Pure-JAX reference mirroring the kernel's cast pattern."""
    xm = x.astype(mxu_dtype)
    h = jnp.einsum("bnd,kd->bnk", xm, w.astype(mxu_dtype),
                   preferred_element_type=jnp.float32) + b
    h = jnp.maximum(h, 0.0)
    return jnp.einsum("bnd,bmd->bnm", xm, h.astype(mxu_dtype),
                      preferred_element_type=jnp.float32)


if __name__ == "__main__":
    key = jax.random.PRNGKey(0)
    B, N, dim = 64, 8, 32      # B independent instances of the (N, dim) module
    G = 16                     # instances per grid step -> M = 128, lanes = 128

    kx, kw, kb = jax.random.split(key, 3)
    x = jax.random.normal(kx, (B, N, dim), dtype=jnp.float32)

    # Deterministic parameter init mimicking the PyTorch module:
    #  - weight: xavier normal, std = sqrt(2 / (fan_in + fan_out))
    #  - bias:   uniform(-1/sqrt(fan_in), 1/sqrt(fan_in))  (nn.Linear default)
    xavier_std = (2.0 / (dim + dim)) ** 0.5
    w = jax.random.normal(kw, (dim, dim), dtype=jnp.float32) * xavier_std
    bound = 1.0 / (dim ** 0.5)
    b = jax.random.uniform(kb, (dim,), dtype=jnp.float32,
                           minval=-bound, maxval=bound)

    # 1) Batched, bf16 MXU operands (perf path for v6e/v7x; fine on v5e too).
    out_bf16 = jax.block_until_ready(
        prediction_layer2_batched(x, w, b, group=G, use_bf16=True))
    ref_bf16 = reference_batched(x, w, b, jnp.bfloat16)
    assert out_bf16.shape == (B, N, N)
    assert jnp.allclose(out_bf16, ref_bf16, atol=5e-2, rtol=5e-2), \
        "bf16 batched kernel mismatch vs bf16 reference"

    # 2) Batched, pure-f32 path (module-exact numerics).
    out_f32 = jax.block_until_ready(
        prediction_layer2_batched(x, w, b, group=G, use_bf16=False))
    ref_f32 = reference_batched(x, w, b, jnp.float32)
    assert jnp.allclose(out_f32, ref_f32, atol=1e-4, rtol=1e-4), \
        "f32 batched kernel mismatch vs f32 reference"

    # 3) Single-instance path, exactly the module's forward.
    out_one = jax.block_until_ready(prediction_layer2(x[0], w, b))
    assert out_one.shape == (N, N)
    assert jnp.allclose(out_one, ref_f32[0], atol=1e-4, rtol=1e-4), \
        "single-instance kernel mismatch vs reference"

    print("KERNEL_OK")
</pallas_src>

<mosaic_0001>
module attributes {stable_mosaic.version = 11 : i64} {
  func.func @prediction_layer2_kernel(%arg0: i32, %arg1: memref<128x32xf32, #tpu.memory_space<vmem>>, %arg2: memref<32x32xf32, #tpu.memory_space<vmem>>, %arg3: memref<1x32xf32, #tpu.memory_space<vmem>>, %arg4: memref<8x128xf32, #tpu.memory_space<vmem>>) attributes {dimension_semantics = [#tpu.dimension_semantics<parallel>], iteration_bounds = array<i64: 4>, scalar_prefetch = 0 : i64, scratch_operands = 0 : i64, tpu.core_type = #tpu.core_type<tc>, window_params = [{transform_indices = @transform_0, window_bounds = array<i64: 128, 32>}, {pipeline_mode = #tpu.pipeline_mode<synchronous>, transform_indices = @transform_1, window_bounds = array<i64: 32, 32>}, {pipeline_mode = #tpu.pipeline_mode<synchronous>, transform_indices = @transform_2, window_bounds = array<i64: 1, 32>}, {transform_indices = @transform_3, window_bounds = array<i64: 8, 128>}]} {
    %c0 = arith.constant 0 : index
    %c0_0 = arith.constant 0 : index
    %0 = vector.load %arg1[%c0, %c0_0] : memref<128x32xf32, #tpu.memory_space<vmem>>, vector<128x32xf32>
    %c0_1 = arith.constant 0 : index
    %c0_2 = arith.constant 0 : index
    %1 = vector.load %arg2[%c0_1, %c0_2] : memref<32x32xf32, #tpu.memory_space<vmem>>, vector<32x32xf32>
    %c0_3 = arith.constant 0 : index
    %c0_4 = arith.constant 0 : index
    %2 = vector.load %arg3[%c0_3, %c0_4] : memref<1x32xf32, #tpu.memory_space<vmem>>, vector<1x32xf32>
    %3 = arith.truncf %0 : vector<128x32xf32> to vector<128x32xbf16>
    %4 = arith.truncf %1 : vector<32x32xf32> to vector<32x32xbf16>
    %cst = arith.constant dense<0.000000e+00> : vector<128x32xf32>
    %5 = tpu.matmul %3, %4, %cst {dimension_numbers = #tpu.dot_dimension_numbers<[1], [1], [0], [0], [0, 0, 1, 0], [], []>} : vector<128x32xbf16>, vector<32x32xbf16>, vector<128x32xf32> -> vector<128x32xf32>
    %6 = vector.broadcast %2 : vector<1x32xf32> to vector<128x32xf32>
    %7 = arith.addf %5, %6 : vector<128x32xf32>
    %cst_5 = arith.constant 0.000000e+00 : f32
    %8 = vector.broadcast %cst_5 : f32 to vector<128x32xf32>
    %9 = arith.maximumf %7, %8 : vector<128x32xf32>
    %10 = vector.shape_cast %0 : vector<128x32xf32> to vector<16x8x32xf32>
    %11 = arith.truncf %10 : vector<16x8x32xf32> to vector<16x8x32xbf16>
    %12 = vector.shape_cast %9 : vector<128x32xf32> to vector<16x8x32xf32>
    %13 = arith.truncf %12 : vector<16x8x32xf32> to vector<16x8x32xbf16>
    %cst_6 = arith.constant dense<0.000000e+00> : vector<16x8x8xf32>
    %14 = tpu.matmul %11, %13, %cst_6 {dimension_numbers = #tpu.dot_dimension_numbers<[2], [2], [1], [1], [0, 0, 0, 1, 1, 1], [0], [0]>} : vector<16x8x32xbf16>, vector<16x8x32xbf16>, vector<16x8x8xf32> -> vector<16x8x8xf32>
    %15 = vector.extract_strided_slice %14 {offsets = [0, 0, 0], sizes = [1, 8, 8], strides = [1, 1, 1]} : vector<16x8x8xf32> to vector<1x8x8xf32>
    %16 = vector.shape_cast %15 : vector<1x8x8xf32> to vector<8x8xf32>
    %c0_7 = arith.constant 0 : index
    %c0_8 = arith.constant 0 : index
    %17 = vector.load %arg4[%c0_7, %c0_8] : memref<8x128xf32, #tpu.memory_space<vmem>>, vector<8x8xf32>
    tpu.vector_store %arg4[%c0_7, %c0_8], %16 {strides = array<i32>} : memref<8x128xf32, #tpu.memory_space<vmem>>, vector<8x8xf32>,
    %18 = vector.extract_strided_slice %14 {offsets = [1, 0, 0], sizes = [1, 8, 8], strides = [1, 1, 1]} : vector<16x8x8xf32> to vector<1x8x8xf32>
    %19 = vector.shape_cast %18 : vector<1x8x8xf32> to vector<8x8xf32>
    %c0_9 = arith.constant 0 : index
    %c8 = arith.constant 8 : index
    %20 = vector.load %arg4[%c0_9, %c8] : memref<8x128xf32, #tpu.memory_space<vmem>>, vector<8x8xf32>
    tpu.vector_store %arg4[%c0_9, %c8], %19 {strides = array<i32>} : memref<8x128xf32, #tpu.memory_space<vmem>>, vector<8x8xf32>,
    %21 = vector.extract_strided_slice %14 {offsets = [2, 0, 0], sizes = [1, 8, 8], strides = [1, 1, 1]} : vector<16x8x8xf32> to vector<1x8x8xf32>
    %22 = vector.shape_cast %21 : vector<1x8x8xf32> to vector<8x8xf32>
    %c0_10 = arith.constant 0 : index
    %c16 = arith.constant 16 : index
    %23 = vector.load %arg4[%c0_10, %c16] : memref<8x128xf32, #tpu.memory_space<vmem>>, vector<8x8xf32>
    tpu.vector_store %arg4[%c0_10, %c16], %22 {strides = array<i32>} : memref<8x128xf32, #tpu.memory_space<vmem>>, vector<8x8xf32>,
    %24 = vector.extract_strided_slice %14 {offsets = [3, 0, 0], sizes = [1, 8, 8], strides = [1, 1, 1]} : vector<16x8x8xf32> to vector<1x8x8xf32>
    %25 = vector.shape_cast %24 : vector<1x8x8xf32> to vector<8x8xf32>
    %c0_11 = arith.constant 0 : index
    %c24 = arith.constant 24 : index
    %26 = vector.load %arg4[%c0_11, %c24] : memref<8x128xf32, #tpu.memory_space<vmem>>, vector<8x8xf32>
    tpu.vector_store %arg4[%c0_11, %c24], %25 {strides = array<i32>} : memref<8x128xf32, #tpu.memory_space<vmem>>, vector<8x8xf32>,
    %27 = vector.extract_strided_slice %14 {offsets = [4, 0, 0], sizes = [1, 8, 8], strides = [1, 1, 1]} : vector<16x8x8xf32> to vector<1x8x8xf32>
    %28 = vector.shape_cast %27 : vector<1x8x8xf32> to vector<8x8xf32>
    %c0_12 = arith.constant 0 : index
    %c32 = arith.constant 32 : index
    %29 = vector.load %arg4[%c0_12, %c32] : memref<8x128xf32, #tpu.memory_space<vmem>>, vector<8x8xf32>
    tpu.vector_store %arg4[%c0_12, %c32], %28 {strides = array<i32>} : memref<8x128xf32, #tpu.memory_space<vmem>>, vector<8x8xf32>,
    %30 = vector.extract_strided_slice %14 {offsets = [5, 0, 0], sizes = [1, 8, 8], strides = [1, 1, 1]} : vector<16x8x8xf32> to vector<1x8x8xf32>
    %31 = vector.shape_cast %30 : vector<1x8x8xf32> to vector<8x8xf32>
    %c0_13 = arith.constant 0 : index
    %c40 = arith.constant 40 : index
    %32 = vector.load %arg4[%c0_13, %c40] : memref<8x128xf32, #tpu.memory_space<vmem>>, vector<8x8xf32>
    tpu.vector_store %arg4[%c0_13, %c40], %31 {strides = array<i32>} : memref<8x128xf32, #tpu.memory_space<vmem>>, vector<8x8xf32>,
    %33 = vector.extract_strided_slice %14 {offsets = [6, 0, 0], sizes = [1, 8, 8], strides = [1, 1, 1]} : vector<16x8x8xf32> to vector<1x8x8xf32>
    %34 = vector.shape_cast %33 : vector<1x8x8xf32> to vector<8x8xf32>
    %c0_14 = arith.constant 0 : index
    %c48 = arith.constant 48 : index
    %35 = vector.load %arg4[%c0_14, %c48] : memref<8x128xf32, #tpu.memory_space<vmem>>, vector<8x8xf32>
    tpu.vector_store %arg4[%c0_14, %c48], %34 {strides = array<i32>} : memref<8x128xf32, #tpu.memory_space<vmem>>, vector<8x8xf32>,
    %36 = vector.extract_strided_slice %14 {offsets = [7, 0, 0], sizes = [1, 8, 8], strides = [1, 1, 1]} : vector<16x8x8xf32> to vector<1x8x8xf32>
    %37 = vector.shape_cast %36 : vector<1x8x8xf32> to vector<8x8xf32>
    %c0_15 = arith.constant 0 : index
    %c56 = arith.constant 56 : index
    %38 = vector.load %arg4[%c0_15, %c56] : memref<8x128xf32, #tpu.memory_space<vmem>>, vector<8x8xf32>
    tpu.vector_store %arg4[%c0_15, %c56], %37 {strides = array<i32>} : memref<8x128xf32, #tpu.memory_space<vmem>>, vector<8x8xf32>,
    %39 = vector.extract_strided_slice %14 {offsets = [8, 0, 0], sizes = [1, 8, 8], strides = [1, 1, 1]} : vector<16x8x8xf32> to vector<1x8x8xf32>
    %40 = vector.shape_cast %39 : vector<1x8x8xf32> to vector<8x8xf32>
    %c0_16 = arith.constant 0 : index
    %c64 = arith.constant 64 : index
    %41 = vector.load %arg4[%c0_16, %c64] : memref<8x128xf32, #tpu.memory_space<vmem>>, vector<8x8xf32>
    tpu.vector_store %arg4[%c0_16, %c64], %40 {strides = array<i32>} : memref<8x128xf32, #tpu.memory_space<vmem>>, vector<8x8xf32>,
    %42 = vector.extract_strided_slice %14 {offsets = [9, 0, 0], sizes = [1, 8, 8], strides = [1, 1, 1]} : vector<16x8x8xf32> to vector<1x8x8xf32>
    %43 = vector.shape_cast %42 : vector<1x8x8xf32> to vector<8x8xf32>
    %c0_17 = arith.constant 0 : index
    %c72 = arith.constant 72 : index
    %44 = vector.load %arg4[%c0_17, %c72] : memref<8x128xf32, #tpu.memory_space<vmem>>, vector<8x8xf32>
    tpu.vector_store %arg4[%c0_17, %c72], %43 {strides = array<i32>} : memref<8x128xf32, #tpu.memory_space<vmem>>, vector<8x8xf32>,
    %45 = vector.extract_strided_slice %14 {offsets = [10, 0, 0], sizes = [1, 8, 8], strides = [1, 1, 1]} : vector<16x8x8xf32> to vector<1x8x8xf32>
    %46 = vector.shape_cast %45 : vector<1x8x8xf32> to vector<8x8xf32>
    %c0_18 = arith.constant 0 : index
    %c80 = arith.constant 80 : index
    %47 = vector.load %arg4[%c0_18, %c80] : memref<8x128xf32, #tpu.memory_space<vmem>>, vector<8x8xf32>
    tpu.vector_store %arg4[%c0_18, %c80], %46 {strides = array<i32>} : memref<8x128xf32, #tpu.memory_space<vmem>>, vector<8x8xf32>,
    %48 = vector.extract_strided_slice %14 {offsets = [11, 0, 0], sizes = [1, 8, 8], strides = [1, 1, 1]} : vector<16x8x8xf32> to vector<1x8x8xf32>
    %49 = vector.shape_cast %48 : vector<1x8x8xf32> to vector<8x8xf32>
    %c0_19 = arith.constant 0 : index
    %c88 = arith.constant 88 : index
    %50 = vector.load %arg4[%c0_19, %c88] : memref<8x128xf32, #tpu.memory_space<vmem>>, vector<8x8xf32>
    tpu.vector_store %arg4[%c0_19, %c88], %49 {strides = array<i32>} : memref<8x128xf32, #tpu.memory_space<vmem>>, vector<8x8xf32>,
    %51 = vector.extract_strided_slice %14 {offsets = [12, 0, 0], sizes = [1, 8, 8], strides = [1, 1, 1]} : vector<16x8x8xf32> to vector<1x8x8xf32>
    %52 = vector.shape_cast %51 : vector<1x8x8xf32> to vector<8x8xf32>
    %c0_20 = arith.constant 0 : index
    %c96 = arith.constant 96 : index
    %53 = vector.load %arg4[%c0_20, %c96] : memref<8x128xf32, #tpu.memory_space<vmem>>, vector<8x8xf32>
    tpu.vector_store %arg4[%c0_20, %c96], %52 {strides = array<i32>} : memref<8x128xf32, #tpu.memory_space<vmem>>, vector<8x8xf32>,
    %54 = vector.extract_strided_slice %14 {offsets = [13, 0, 0], sizes = [1, 8, 8], strides = [1, 1, 1]} : vector<16x8x8xf32> to vector<1x8x8xf32>
    %55 = vector.shape_cast %54 : vector<1x8x8xf32> to vector<8x8xf32>
    %c0_21 = arith.constant 0 : index
    %c104 = arith.constant 104 : index
    %56 = vector.load %arg4[%c0_21, %c104] : memref<8x128xf32, #tpu.memory_space<vmem>>, vector<8x8xf32>
    tpu.vector_store %arg4[%c0_21, %c104], %55 {strides = array<i32>} : memref<8x128xf32, #tpu.memory_space<vmem>>, vector<8x8xf32>,
    %57 = vector.extract_strided_slice %14 {offsets = [14, 0, 0], sizes = [1, 8, 8], strides = [1, 1, 1]} : vector<16x8x8xf32> to vector<1x8x8xf32>
    %58 = vector.shape_cast %57 : vector<1x8x8xf32> to vector<8x8xf32>
    %c0_22 = arith.constant 0 : index
    %c112 = arith.constant 112 : index
    %59 = vector.load %arg4[%c0_22, %c112] : memref<8x128xf32, #tpu.memory_space<vmem>>, vector<8x8xf32>
    tpu.vector_store %arg4[%c0_22, %c112], %58 {strides = array<i32>} : memref<8x128xf32, #tpu.memory_space<vmem>>, vector<8x8xf32>,
    %60 = vector.extract_strided_slice %14 {offsets = [15, 0, 0], sizes = [1, 8, 8], strides = [1, 1, 1]} : vector<16x8x8xf32> to vector<1x8x8xf32>
    %61 = vector.shape_cast %60 : vector<1x8x8xf32> to vector<8x8xf32>
    %c0_23 = arith.constant 0 : index
    %c120 = arith.constant 120 : index
    %62 = vector.load %arg4[%c0_23, %c120] : memref<8x128xf32, #tpu.memory_space<vmem>>, vector<8x8xf32>
    tpu.vector_store %arg4[%c0_23, %c120], %61 {strides = array<i32>} : memref<8x128xf32, #tpu.memory_space<vmem>>, vector<8x8xf32>,
    return
  }
  func.func @transform_0(%arg0: i32) -> (i32, i32) {
    %c0_i32 = arith.constant 0 : i32
    %c0_i32_0 = arith.constant 0 : i32
    return %arg0, %c0_i32 : i32, i32
  }
  func.func @transform_1(%arg0: i32) -> (i32, i32) {
    %c0_i32 = arith.constant 0 : i32
    %c0_i32_0 = arith.constant 0 : i32
    %c0_i32_1 = arith.constant 0 : i32
    return %c0_i32, %c0_i32_0 : i32, i32
  }
  func.func @transform_2(%arg0: i32) -> (i32, i32) {
    %c0_i32 = arith.constant 0 : i32
    %c0_i32_0 = arith.constant 0 : i32
    %c0_i32_1 = arith.constant 0 : i32
    return %c0_i32, %c0_i32_0 : i32, i32
  }
  func.func @transform_3(%arg0: i32) -> (i32, i32) {
    %c0_i32 = arith.constant 0 : i32
    %c0_i32_0 = arith.constant 0 : i32
    return %c0_i32, %arg0 : i32, i32
  }
}

</mosaic_0001>

<bundles_post_ra>
// kernel: tpu_custom_call.1
= control target key start
LH: loop header
LB: loop body
LE: loop exit
PB: predicated region body
PF: predicated region fallthrough
CT: control target
= control target key end

     0   :  { %8 = vsyncpa [#allocation3], 0  ;;  %s1263_s0 = inlined_call_operand.vmem [shape: f32[512,32], index: 0, kind: input, shape index: {}]   ;;  %s1264_s1 = inlined_call_operand.vmem [shape: f32[32,32], index: 1, kind: input, shape index: {}]   ;;  %s1265_s2 = inlined_call_operand.vmem [shape: f32[1,32], index: 2, kind: input, shape index: {}]   ;;  %s1266_s3 = inlined_call_operand.hbm [shape: f32[8,512], index: 3, kind: output, shape index: {}]  }
   0x1   :  { %10 = vsyncpa [#allocation3 + $0x1], 0  ;;  %s998_s12 = smov 0   ;;  %s1000_s13 = smov 0  }
   0x2   :  { %s1002_s14 = smov 0   ;;  %s1004_s15 = smov 0  }
   0x3 LB: > { %s1019_s16 = sadd.s32 4294967295, %s961_s15   ;;  %s805_s17 = sadd.s32 4294967294, %s961_s15   ;;  %s961_s15 = sphi %s1004_s15, %s1272_s15   ;;  %s957_s14 = sphi %s1002_s14, %s1271_s14   ;;  %s953_s13 = sphi %s1000_s13, %s1270_s13   ;;  %s949_s12 = sphi %s998_s12, %s1269_s12  }
   0x4   : > { %s1023_s18 = sadd.s32 1, %s961_s15   ;;  %s91_s19 = sadd.s32 1, %s957_s14 }
   0x5   : > { %s88_s20 = ssub.s32 %s961_s15, %s1023_s18  ;;  %p101_p0 = scmp.ne.s32.totalorder %s957_s14, %s953_s13 }
   0x6   : > { %p89_p1 = scmp.eq.s32.totalorder %s88_s20, 0  ;;  %p102_p2 = scmp.eq.s32.totalorder %s1019_s16, 3 }
   0x7   : > { %p107_p3 = scmp.ne.s32.totalorder %s953_s13, %s949_s12  ;;  %p108_p4 = scmp.eq.s32.totalorder %s805_s17, 3 }
   0x8   : > { %s1034_s21 = scalar_select %p89_p1, %s957_s14, %s91_s19  }
   0x9   : > { %p1036_p5 = por %p102_p2, %p101_p0  ;;  %p1040_p6 = por %p108_p4, %p107_p3 }
   0xa   : > { %p808_p7 = scmp.ge.s32.totalorder %s961_s15, 1  ;;  %p141_p8 = scmp.lt.s32.totalorder %s961_s15, 5 }
   0xc   : > { %p142_p9 = pnand %p808_p7, %p141_p8 }
   0xd   : > { %s810_s28 = sshll.u32 (!%p142_p9), %s1019_s16, 4  ;;  %s162_s17 = sand.u32 (!%p142_p9), 1, %s953_s13  }
   0xe   : > { %145 = sbr.rel (%p142_p9) target bundleno = 534 (0x216), region = 32  ;;  %p166_p10 = scmp.lt.s32.totalorder (!%p142_p9), %s810_s28, 63 }
   0xf   : > { %s809_s19 = sshll.u32 (!%p142_p9), %s162_s17, 3  ;;  %s963_s24 = smov (!%p142_p9), 8  }
  0x10   : > { %s1211_s20 = scalar_lea.vmem (!%p142_p9), [#allocation2], %s809_s19  ;;  %s964_s25 = smov (!%p142_p9), 16  }
  0x11   : > { %s965_s26 = smov (!%p142_p9), 24   ;;  %s966_s27 = smov (!%p142_p9), 32  }
  0x12   : > { %s968_s29 = smov (!%p142_p9), 48   ;;  %s969_s30 = smov (!%p142_p9), 56  }
  0x13   : > { %v190_v0 = vld [vmem:[%s1264_s1 + $0x10] sm:$0xff]  ;;  %v191_v1 = vld [vmem:[%s1264_s1 + $0x18] sm:$0xff]  ;;  %vm206_vm0 = vcmask 261120   ;;  %v188_v3 = vld [vmem:[%s1264_s1] sm:$0xff]  ;;  %s1274_s28 = smov (!%p166_p10, %s810_s28), 63  ;;  %vm638_vm1 = vcmask 64512  }
  0x14   : > { %v202_v2 = vpack.c.bf16 %v191_v1, %v190_v0  ;;  %v189_v4 = vld [vmem:[%s1264_s1 + $0x8] sm:$0xff]  ;;  %s811_s6 = sshll.u32 %s1274_s28, 3  ;;  %v1132_v32 = vld [vmem:[%s1265_s2] ss:$0 sm:$0xff]  ;;  %s967_s28 = smov 40   ;;  %vm644_vm2 = vcmask 130112  }
  0x15   : > { %v201_v6 = vpack.c.bf16 %v189_v4, %v188_v3  ;;  %s1064_s9 = scalar_lea.vmem %s1263_s0, %s811_s6  ;;  %s970_s4 = smov 64   ;;  %vm650_vm3 = vcmask 195712   ;;  %vm656_vm4 = vcmask 261312   ;;  %vm662_vm5 = vcmask 326912  }
  0x16   : > { %v235_v5 = vsel %vm206_vm0, %v202_v2, 0  ;;  %v172_v8 = vld [vmem:[%s1064_s9] sm:$0xff]  ;;  %v173_v9 = vld [vmem:[%s1064_s9 + $0x8] sm:$0xff]  ;;  %v174_v11 = vld [vmem:[%s1064_s9 + $0x10] sm:$0xff]  ;;  %s971_s5 = smov 72   ;;  %s972_s6 = smov 80  }
  0x17   : > { %243 = vmatpush.bf16.xpose.msra.mxu0 %v235_v5  ;;  %840 = vmatpush.bf16.xpose.msra.mxu2 %v235_v5  ;;  %v232_v7 = vsel %vm206_vm0, %v201_v6, 0  ;;  %v193_v10 = vpack.c.bf16 %v173_v9, %v172_v8  ;;  %v1071_v12 = vld [vmem:[%s1064_s9 + $0x18] sm:$0xff]  ;;  %v1076_v14 = vld [vmem:[%s1064_s9 + $0x20] sm:$0xff]  ;;  %v1079_v15 = vld [vmem:[%s1064_s9 + $0x28] sm:$0xff]  ;;  %v302_v41 = vpack.c.bf16 %v172_v8, %v172_v8  ;;  %v303_v46 = vpack.c.bf16 %v173_v9, %v173_v9  ;;  %s973_s7 = smov 96   ;;  %s974_s8 = smov 88  }
  0x18   : > { %841 = vmatpush.bf16.xpose.msra.mxu3 %v235_v5  ;;  %v194_v13 = vpack.c.bf16 %v1071_v12, %v174_v11  ;;  %v195_v16 = vpack.c.bf16 %v1079_v15, %v1076_v14  ;;  %v1085_v17 = vld [vmem:[%s1064_s9 + $0x30] sm:$0xff]  ;;  %v1088_v18 = vld [vmem:[%s1064_s9 + $0x38] sm:$0xff]  ;;  %v1093_v20 = vld [vmem:[%s1064_s9 + $0x60] sm:$0xff]  ;;  %v304_v52 = vpack.c.bf16 %v174_v11, %v174_v11  ;;  %v305_v58 = vpack.c.bf16 %v1071_v12, %v1071_v12  ;;  %s976_s10 = smov 120   ;;  %s977_s11 = smov 112  }
  0x19   : > { %v196_v19 = vpack.c.bf16 %v1088_v18, %v1085_v17  ;;  %v1096_v21 = vld [vmem:[%s1064_s9 + $0x68] sm:$0xff]  ;;  %v1102_v23 = vld [vmem:[%s1064_s9 + $0x70] sm:$0xff]  ;;  %v1105_v24 = vld [vmem:[%s1064_s9 + $0x78] sm:$0xff]  ;;  %v306_v0 = vpack.c.bf16 %v1076_v14, %v1076_v14  ;;  %v307_v6 = vpack.c.bf16 %v1079_v15, %v1079_v15  ;;  %v308_v12 = vpack.c.bf16 %v1085_v17, %v1085_v17  ;;  %s837_s19 = sshll.u32 %s1019_s16, 3 }
  0x1a   : > { %v199_v22 = vpack.c.bf16 %v1096_v21, %v1093_v20  ;;  %v200_v25 = vpack.c.bf16 %v1105_v24, %v1102_v23  ;;  %v1112_v26 = vld [vmem:[%s1064_s9 + $0x40] sm:$0xff]  ;;  %v1115_v27 = vld [vmem:[%s1064_s9 + $0x48] sm:$0xff]  ;;  %v1121_v29 = vld [vmem:[%s1064_s9 + $0x50] sm:$0xff]  ;;  %vm668_vm6 = vcmask 392512   ;;  %vm674_vm7 = vcmask 458112  }
  0x1b   : > { %v197_v28 = vpack.c.bf16 %v1115_v27, %v1112_v26  ;;  %v1124_v30 = vld [vmem:[%s1064_s9 + $0x58] sm:$0xff]  ;;  %s975_s9 = smov 104   ;;  %vm680_vm8 = vcmask 523712   ;;  %vm686_vm9 = vcmask 589312   ;;  %vm692_vm10 = vcmask 654912  }
  0x1c   : > { %v198_v31 = vpack.c.bf16 %v1124_v30, %v1121_v29  ;;  %vm698_vm11 = vcmask 720512   ;;  %vm704_vm12 = vcmask 786112   ;;  %vm710_vm13 = vcmask 851712  }
  0x1d   : > { %vm716_vm14 = vcmask 917312   ;;  %vm722_vm15 = vcmask 982912  }
  0x1f   : > { %244 = vmatpush.bf16.xpose.msra.mxu0 %v232_v7  ;;  %842 = vmatpush.bf16.xpose.msra.mxu2 %v232_v7 }
  0x20   : > { %843 = vmatpush.bf16.xpose.msra.mxu3 %v232_v7 }
  0x26   : > { %812 = vmatmul.msk.bf16.vlgmr.msra.gmra.mxu0 %vm206_vm0, %v193_v10  ;;  %818 = vmatmul.msk.bf16.vlgmr.msra.gmra.mxu2 %vm206_vm0, %v199_v22 }
  0x27   : > { %819 = vmatmul.msk.bf16.vlgmr.msra.gmra.mxu3 %vm206_vm0, %v200_v25 }
  0x36   : > { %813 = vmatmul.msk.bf16.gmra.mxu0 %vm206_vm0, %v194_v13 }
  0x46   : > { %814 = vmatmul.msk.bf16.gmra.mxu0 %vm206_vm0, %v195_v16 }
  0x56   : > { %815 = vmatmul.msk.bf16.gmra.mxu0 %vm206_vm0, %v196_v19 }
  0x66   : > { %816 = vmatmul.msk.bf16.gmra.mxu0 %vm206_vm0, %v197_v28 }
  0x76   : > { %817 = vmatmul.msk.bf16.gmra.mxu0 %vm206_vm0, %v198_v31  ;;  %v309_v31 = vpack.c.bf16 %v1088_v18, %v1088_v18  ;;  %v310_v18 = vpack.c.bf16 %v1112_v26, %v1112_v26  ;;  %v311_v26 = vpack.c.bf16 %v1115_v27, %v1115_v27  ;;  %v312_v27 = vpack.c.bf16 %v1121_v29, %v1121_v29 }
  0x77   : > { %v315_v29 = vpack.c.bf16 %v1096_v21, %v1096_v21 }
  0xa3   : > { %v246_v33 = vpop.f32.mrf.mxu0 }
  0xa4   : > { %v247_v34 = vadd.f32 %v1132_v32, %v246_v33 }
  0xa6   : > { %v286_v35 = vmax.f32 %v247_v34, 0.0 }
  0xa8   : > { %v318_v36 = vpack.c.bf16 %v286_v35, %v286_v35 }
  0xa9   : > { %v276_v16 = vpop.f32.mrf.mxu2 }
  0xaa   : > { %v338_v37 = vsel %vm206_vm0, %v318_v36, 0  ;;  %v281_v19 = vpop.f32.mrf.mxu3  ;;  %v277_v28 = vadd.f32 %v1132_v32, %v276_v16 }
  0xab   : > { %v248_v38 = vpop.f32.mrf.mxu0  ;;  %347 = vmatpush.bf16.xpose.msra.mxu1 %v338_v37 }
  0xac   : > { %v249_v39 = vadd.f32 %v1132_v32, %v248_v38  ;;  %v298_v17 = vmax.f32 %v277_v28, 0.0 }
  0xae   : > { %v287_v40 = vmax.f32 %v249_v39, 0.0 }
  0xb0   : > { %v319_v42 = vpack.c.bf16 %v287_v40, %v287_v40 }
  0xb1   : > { %v278_v37 = vpop.f32.mrf.mxu2 }
  0xb2   : > { %v357_v43 = vsel %vm206_vm0, %v319_v42, 0  ;;  %820 = vmatmul.msk.bf16.vlgmr.msra.gmra.mxu1 %vm206_vm0, %v302_v41  ;;  %v283_v35 = vpop.f32.mrf.mxu3  ;;  %v330_v41 = vpack.c.bf16 %v298_v17, %v298_v17  ;;  %v279_v42 = vadd.f32 %v1132_v32, %v278_v37 }
  0xb3   : > { %v251_v44 = vpop.f32.mrf.mxu0  ;;  %366 = vmatpush.bf16.xpose.msrb.mxu2 %v357_v43  ;;  %v284_v40 = vadd.f32 %v1132_v32, %v283_v35 }
  0xb4   : > { %v252_v45 = vadd.f32 %v1132_v32, %v251_v44 }
  0xb6   : > { %v288_v47 = vmax.f32 %v252_v45, 0.0  ;;  %v301_v45 = vmax.f32 %v284_v40, 0.0 }
  0xb8   : > { %v320_v48 = vpack.c.bf16 %v288_v47, %v288_v47  ;;  %v566_v47 = vsel %vm206_vm0, %v330_v41, 0 }
  0xba   : > { %v376_v49 = vsel %vm206_vm0, %v320_v48, 0  ;;  %821 = vmatmul.msk.bf16.vlgmr.msrb.gmra.mxu2 %vm206_vm0, %v303_v46  ;;  %v299_v46 = vmax.f32 %v279_v42, 0.0 }
  0xbb   : > { %v253_v50 = vpop.f32.mrf.mxu0  ;;  %385 = vmatpush.bf16.xpose.msrb.mxu3 %v376_v49 }
  0xbc   : > { %v254_v51 = vadd.f32 %v1132_v32, %v253_v50 }
  0xbe   : > { %v289_v53 = vmax.f32 %v254_v51, 0.0  ;;  %v333_v51 = vpack.c.bf16 %v301_v45, %v301_v45 }
  0xc0   : > { %v321_v54 = vpack.c.bf16 %v289_v53, %v289_v53  ;;  %v282_v53 = vadd.f32 %v1132_v32, %v281_v19 }
  0xc2   : > { %v395_v55 = vsel %vm206_vm0, %v321_v54, 0  ;;  %822 = vmatmul.msk.bf16.vlgmr.msrb.gmra.mxu3 %vm206_vm0, %v304_v52  ;;  %v331_v52 = vpack.c.bf16 %v299_v46, %v299_v46 }
  0xc3   : > { %v256_v56 = vpop.f32.mrf.mxu0  ;;  %404 = vmatpush.bf16.xpose.msrb.mxu1 %v395_v55 }
  0xc4   : > { %v257_v57 = vadd.f32 %v1132_v32, %v256_v56  ;;  %v623_v56 = vsel %vm206_vm0, %v333_v51, 0 }
  0xc6   : > { %v290_v59 = vmax.f32 %v257_v57, 0.0  ;;  %v300_v57 = vmax.f32 %v282_v53, 0.0 }
  0xc8   : > { %v322_v60 = vpack.c.bf16 %v290_v59, %v290_v59 }
  0xca   : > { %v414_v61 = vsel %vm206_vm0, %v322_v60, 0  ;;  %823 = vmatmul.msk.bf16.vlgmr.msrb.gmra.mxu1 %vm206_vm0, %v305_v58  ;;  %v585_v58 = vsel %vm206_vm0, %v331_v52, 0 }
  0xcb   : > { %v258_v62 = vpop.f32.mrf.mxu0  ;;  %423 = vmatpush.bf16.xpose.msra.mxu2 %v414_v61 }
  0xcc   : > { %v259_v63 = vadd.f32 %v1132_v32, %v258_v62  ;;  %v332_v62 = vpack.c.bf16 %v300_v57, %v300_v57 }
  0xce   : > { %v291_v1 = vmax.f32 %v259_v63, 0.0 }
  0xd0   : > { %v323_v2 = vpack.c.bf16 %v291_v1, %v291_v1  ;;  %v604_v1 = vsel %vm206_vm0, %v332_v62, 0 }
  0xd2   : > { %v433_v3 = vsel %vm206_vm0, %v323_v2, 0  ;;  %824 = vmatmul.msk.bf16.vlgmr.msra.gmra.mxu2 %vm206_vm0, %v306_v0 }
  0xd3   : > { %v261_v4 = vpop.f32.mrf.mxu0  ;;  %442 = vmatpush.bf16.xpose.msra.mxu3 %v433_v3  ;;  %v314_v3 = vpack.c.bf16 %v1093_v20, %v1093_v20 }
  0xd4   : > { %v262_v5 = vadd.f32 %v1132_v32, %v261_v4  ;;  %v316_v4 = vpack.c.bf16 %v1102_v23, %v1102_v23 }
  0xd6   : > { %v292_v7 = vmax.f32 %v262_v5, 0.0  ;;  %v317_v5 = vpack.c.bf16 %v1105_v24, %v1105_v24 }
  0xd8   : > { %v324_v8 = vpack.c.bf16 %v292_v7, %v292_v7 }
  0xda   : > { %v452_v9 = vsel %vm206_vm0, %v324_v8, 0  ;;  %825 = vmatmul.msk.bf16.vlgmr.msra.gmra.mxu3 %vm206_vm0, %v307_v6 }
  0xdb   : > { %v263_v10 = vpop.f32.mrf.mxu0  ;;  %461 = vmatpush.bf16.xpose.msra.mxu1 %v452_v9 }
  0xdc   : > { %v264_v11 = vadd.f32 %v1132_v32, %v263_v10 }
  0xde   : > { %v293_v13 = vmax.f32 %v264_v11, 0.0 }
  0xe0   : > { %v325_v14 = vpack.c.bf16 %v293_v13, %v293_v13 }
  0xe2   : > { %v471_v22 = vsel %vm206_vm0, %v325_v14, 0  ;;  %826 = vmatmul.msk.bf16.vlgmr.msra.gmra.mxu1 %vm206_vm0, %v308_v12 }
  0xe3   : > { %v266_v15 = vpop.f32.mrf.mxu0  ;;  %480 = vmatpush.bf16.xpose.msrb.mxu2 %v471_v22 }
  0xe4   : > { %v267_v25 = vadd.f32 %v1132_v32, %v266_v15 }
  0xe6   : > { %v294_v33 = vmax.f32 %v267_v25, 0.0 }
  0xe8   : > { %v326_v34 = vpack.c.bf16 %v294_v33, %v294_v33 }
  0xea   : > { %v490_v36 = vsel %vm206_vm0, %v326_v34, 0  ;;  %827 = vmatmul.msk.bf16.vlgmr.msrb.gmra.mxu2 %vm206_vm0, %v309_v31 }
  0xeb   : > { %v268_v38 = vpop.f32.mrf.mxu0  ;;  %499 = vmatpush.bf16.xpose.msrb.mxu3 %v490_v36 }
  0xec   : > { %v269_v39 = vadd.f32 %v1132_v32, %v268_v38 }
  0xee   : > { %v295_v43 = vmax.f32 %v269_v39, 0.0 }
  0xf0   : > { %v327_v44 = vpack.c.bf16 %v295_v43, %v295_v43 }
  0xf2   : > { %v509_v48 = vsel %vm206_vm0, %v327_v44, 0  ;;  %828 = vmatmul.msk.bf16.vlgmr.msrb.gmra.mxu3 %vm206_vm0, %v310_v18 }
  0xf3   : > { %v271_v49 = vpop.f32.mrf.mxu0  ;;  %518 = vmatpush.bf16.xpose.msrb.mxu1 %v509_v48 }
  0xf4   : > { %v272_v50 = vadd.f32 %v1132_v32, %v271_v49 }
  0xf6   : > { %v296_v54 = vmax.f32 %v272_v50, 0.0 }
  0xf8   : > { %v328_v55 = vpack.c.bf16 %v296_v54, %v296_v54 }
  0xfa   : > { %v528_v59 = vsel %vm206_vm0, %v328_v55, 0  ;;  %829 = vmatmul.msk.bf16.vlgmr.msrb.gmra.mxu1 %vm206_vm0, %v311_v26 }
  0xfb   : > { %575 = vmatpush.bf16.xpose.msra.mxu1 %v566_v47  ;;  %v273_v60 = vpop.f32.mrf.mxu0  ;;  %537 = vmatpush.bf16.xpose.msra.mxu2 %v528_v59 }
  0xfc   : > { %v274_v61 = vadd.f32 %v1132_v32, %v273_v60  ;;  %v313_v32 = vpack.c.bf16 %v1124_v30, %v1124_v30 }
  0xfe   : > { %v297_v63 = vmax.f32 %v274_v61, 0.0 }
 0x100   : > { %v329_v0 = vpack.c.bf16 %v297_v63, %v297_v63 }
 0x102   : > { %v547_v2 = vsel %vm206_vm0, %v329_v0, 0  ;;  %830 = vmatmul.msk.bf16.vlgmr.msra.gmra.mxu2 %vm206_vm0, %v312_v27 }
 0x103   : > { %632 = vmatpush.bf16.xpose.msrb.mxu1 %v623_v56  ;;  %594 = vmatpush.bf16.xpose.msrb.mxu2 %v585_v58 }
 0x104   : > { %556 = vmatpush.bf16.xpose.msra.mxu3 %v547_v2 }
 0x10a   : > { %832 = vmatmul.msk.bf16.vlgmr.msra.gmra.mxu1 %vm206_vm0, %v314_v3 }
 0x10b   : > { %831 = vmatmul.msk.bf16.vlgmr.msra.gmra.mxu3 %vm206_vm0, %v313_v32 }
 0x10c   : > { %613 = vmatpush.bf16.xpose.msrb.mxu3 %v604_v1 }
 0x112   : > { %833 = vmatmul.msk.bf16.vlgmr.msrb.gmra.mxu2 %vm206_vm0, %v315_v29 }
 0x11a   : > { %835 = vmatmul.msk.bf16.vlgmr.msrb.gmra.mxu1 %vm206_vm0, %v317_v5 }
 0x11b   : > { %834 = vmatmul.msk.bf16.vlgmr.msrb.gmra.mxu3 %vm206_vm0, %v316_v4  ;;  %vm728_vm0 = vcmask 1048512  }
 0x12f   : > { %v349_v20 = vpop.f32.mrf.mxu1 }
 0x130   : > { %639 = vst.msk [vmem:[%s1211_s20] sm:$0xff] %vm638_vm1, %v349_v20 }
 0x137   : > { %v351_v21 = vpop.f32.mrf.mxu1 }
 0x13d   : > { %v368_v30 = vpop.f32.mrf.mxu2 }
 0x13e   : > { %641 = vrot.lane.b32.xlu0 %v368_v30, %s963_s24 }
 0x145   : > { %v370_v23 = vpop.f32.mrf.mxu2  ;;  %v387_v6 = vpop.f32.mrf.mxu3 }
 0x146   : > { %647 = vrot.lane.b32.xlu0 %v387_v6, %s964_s25 }
 0x147   : > { %v406_v24 = vpop.f32.mrf.mxu1 }
 0x148   : > { %653 = vrot.lane.b32.xlu1 %v406_v24, %s965_s26  ;;  %s741_s26 = scalar_lea.hbm %s1266_s3, %s837_s19 }
 0x14d   : > { %v389_v7 = vpop.f32.mrf.mxu3 }
 0x14f   : > { %v408_v8 = vpop.f32.mrf.mxu1 }
 0x155   : > { %v425_v9 = vpop.f32.mrf.mxu2 }
 0x156   : > { %659 = vrot.lane.b32.xlu1 %v425_v9, %s966_s27  ;;  %s743_s27 = sshll.u32 %s1211_s20, 4  ;;  %s744_s27 = int_to_ptr.vmem [resolvable:$true] %s743_s27 }
 0x15d   : > { %v444_v10 = vpop.f32.mrf.mxu3  ;;  %v427_v11 = vpop.f32.mrf.mxu2 }
 0x15e   : > { %665 = vrot.lane.b32.xlu2 %v444_v10, %s967_s28  ;;  %s745_s28 = sshll.u32 %s741_s26, 4  ;;  %s746_s28 = int_to_ptr.hbm [resolvable:$true] %s745_s28 }
 0x15f   : > { %v463_v12 = vpop.f32.mrf.mxu1  ;;  %s913_s16 = sshra.s32 %s746_s28, 4  ;;  %s914_s16 = int_to_ptr.hbm [resolvable:$true] %s913_s16 }
 0x160   : > { %p920_p0 = scmp.lt.s32.totalorder %s914_s16, %s1266_s3 }
 0x165   : > { %v446_v13 = vpop.f32.mrf.mxu3 }
 0x166   : > { %671 = vrot.lane.b32.xlu2 %v463_v12, %s968_s29  ;;  %s731_s29 = scalar_lea.sflag [#allocation3], %s162_s17 }
 0x167   : > { %v465_v14 = vpop.f32.mrf.mxu1 }
 0x16d   : > { %v482_v16 = vpop.f32.mrf.mxu2 }
 0x16e   : > { %677 = vrot.lane.b32.xlu0 %v482_v16, %s969_s30  ;;  %s915_s30 = scalar_lea.hbm %s914_s16, 8 }
 0x16f   : > { %p916_p11 = scmp.ne.s32.totalorder %s914_s16, %s915_s30 }
 0x171   : > { %p917_p12 = pnand %p916_p11, %p1036_p5 }
 0x173   : > { %p918_p13 = pneg %p917_p12 }
 0x175   : > { %v501_v19 = vpop.f32.mrf.mxu3  ;;  %v484_v22 = vpop.f32.mrf.mxu2 }
 0x176   : > { %683 = vrot.lane.b32.xlu1 %v501_v19, %s970_s4 }
 0x177   : > { %v520_v15 = vpop.f32.mrf.mxu1 }
 0x178   : > { %689 = vrot.lane.b32.xlu2 %v520_v15, %s971_s5 }
 0x17d   : > { %v503_v25 = vpop.f32.mrf.mxu3 }
 0x17f   : > { %v522_v28 = vpop.f32.mrf.mxu1 }
 0x185   : > { %v539_v31 = vpop.f32.mrf.mxu2 }
 0x186   : > { %695 = vrot.lane.b32.xlu0 %v539_v31, %s972_s6  ;;  %s919_s6 = scalar_lea.hbm %s1266_s3, 32 }
 0x187   : > { %v577_v33 = vpop.f32.mrf.mxu1  ;;  %p921_p1 = scmp.lt.s32.totalorder %s919_s6, %s915_s30 }
 0x188   : > { %707 = vrot.lane.b32.xlu2 %v577_v33, %s973_s7 }
 0x189   : > { %p922_p2 = por %p921_p1, %p920_p0 }
 0x18b   : > { %p923_p3 = pnand %p922_p2, %p918_p13 }
 0x18d   : > { %v541_v17 = vpop.f32.mrf.mxu2 }
 0x18e   : > { %v558_v34 = vpop.f32.mrf.mxu3 }
 0x18f   : > { %701 = vrot.lane.b32.xlu1 %v558_v34, %s974_s8  ;;  %v579_v35 = vpop.f32.mrf.mxu1 }
 0x195   : > { %v596_v37 = vpop.f32.mrf.mxu2 }
 0x196   : > { %v560_v36 = vpop.f32.mrf.mxu3  ;;  %713 = vrot.lane.b32.xlu0 %v596_v37, %s975_s9 }
 0x197   : > { %v634_v38 = vpop.f32.mrf.mxu1 }
 0x198   : > { %725 = vrot.lane.b32.xlu2 %v634_v38, %s976_s10 }
 0x19d   : > { %v598_v40 = vpop.f32.mrf.mxu2 }
 0x19e   : > { %v615_v39 = vpop.f32.mrf.mxu3 }
 0x19f   : > { %719 = vrot.lane.b32.xlu1 %v615_v39, %s977_s11  ;;  %v636_v41 = vpop.f32.mrf.mxu1 }
 0x1a6   : > { %v617_v42 = vpop.f32.mrf.mxu3 }
 0x1b0   : > { %v642_v18 = vpop.permute.xlu0 %641 }
 0x1b1   : > { %645 = vst.msk [vmem:[%s1211_s20] sm:$0xff] %vm644_vm2, %v642_v18 }
 0x1b8   : > { %v648_v43 = vpop.permute.xlu0 %647  ;;  %v666_v45 = vpop.permute.xlu2 %665 }
 0x1b9   : > { %651 = vst.msk [vmem:[%s1211_s20] sm:$0xff] %vm650_vm3, %v648_v43 }
 0x1ba   : > { %v654_v44 = vpop.permute.xlu1 %653 }
 0x1bb   : > { %657 = vst.msk [vmem:[%s1211_s20] sm:$0xff] %vm656_vm4, %v654_v44 }
 0x1c0   : > { %v672_v47 = vpop.permute.xlu2 %671 }
 0x1c8   : > { %v660_v46 = vpop.permute.xlu1 %659 }
 0x1c9   : > { %663 = vst.msk [vmem:[%s1211_s20] sm:$0xff] %vm662_vm5, %v660_v46 }
 0x1ca   : > { %669 = vst.msk [vmem:[%s1211_s20] sm:$0xff] %vm668_vm6, %v666_v45 }
 0x1cb   : > { %675 = vst.msk [vmem:[%s1211_s20] sm:$0xff] %vm674_vm7, %v672_v47 }
 0x1d2   : > { %v690_v49 = vpop.permute.xlu2 %689 }
 0x1e0   : > { %v678_v48 = vpop.permute.xlu0 %677 }
 0x1e1   : > { %681 = vst.msk [vmem:[%s1211_s20] sm:$0xff] %vm680_vm8, %v678_v48 }
 0x1e2   : > { %v708_v52 = vpop.permute.xlu2 %707 }
 0x1e8   : > { %v684_v50 = vpop.permute.xlu1 %683 }
 0x1e9   : > { %687 = vst.msk [vmem:[%s1211_s20] sm:$0xff] %vm686_vm9, %v684_v50 }
 0x1ea   : > { %693 = vst.msk [vmem:[%s1211_s20] sm:$0xff] %vm692_vm10, %v690_v49 }
 0x1f2   : > { %v726_v54 = vpop.permute.xlu2 %725 }
 0x1f8   : > { %v696_v51 = vpop.permute.xlu0 %695 }
 0x1f9   : > { %699 = vst.msk [vmem:[%s1211_s20] sm:$0xff] %vm698_vm11, %v696_v51 }
 0x201   : > { %v702_v53 = vpop.permute.xlu1 %701 }
 0x202   : > { %705 = vst.msk [vmem:[%s1211_s20] sm:$0xff] %vm704_vm12, %v702_v53 }
 0x203   : > { %711 = vst.msk [vmem:[%s1211_s20] sm:$0xff] %vm710_vm13, %v708_v52 }
 0x208   : > { %v714_v26 = vpop.permute.xlu0 %713 }
 0x209   : > { %717 = vst.msk [vmem:[%s1211_s20] sm:$0xff] %vm716_vm14, %v714_v26 }
 0x211   : > { %v720_v55 = vpop.permute.xlu1 %719 }
 0x212   : > { %723 = vst.msk [vmem:[%s1211_s20] sm:$0xff] %vm722_vm15, %v720_v55 }
 0x213   : > { %729 = vst.msk [vmem:[%s1211_s20] sm:$0xff] %vm728_vm0, %v726_v54 }
 0x214   : > { %926 = shalt.err (!%p923_p3)
}
 0x215   : > { %844 = dma.vmem_to_hbm [thread:$0]  (%p1036_p5), %s744_s27, 128, %s746_s28, %s731_s29  }
 0x216 PF: > { %p850_p4 = scmp.ge.s32.totalorder %s961_s15, 2  ;;  %s757_s17 = sand.u32 1, %s949_s12  }
 0x217   : > { %s758_s20 = scalar_lea.sflag [#allocation3], %s757_s17 }
 0x218   : > { %p847_p7 = pnand %p850_p4, %p1040_p6 }
 0x21a   : > { %p848_p8 = pneg %p847_p7 }
 0x21c   : > { %944 = dma.done.wait (%p848_p8), %s758_s20, 128  }
 0x21d   : > { %946 = vsyncadd (%p848_p8), %s758_s20, 4294967168  ;;  %p13_p9 = scmp.ge.s32.totalorder %s1023_s18, 6   ;;  %s1269_s12 = smov %s953_s13 }
 0x21e   : > { %s1270_s13 = smov %s957_s14  ;;  %s1271_s14 = smov %s1034_s21 }
 0x21f   : > { %s1272_s15 = smov %s1023_s18  ;;  %15 = sbr.rel (!%p13_p9) target bundleno = 3 (0x3), region = 67 }
 0x224   :  { %764 = vsyncpa [#allocation3], 1 }
 0x225   :  { %766 = vsyncpa [#allocation3 + $0x1], 1 }

</bundles_post_ra>
